<compile_context>
chip_gen: v7x
topology: tpu7x:2x2x1
jax: 0.10.0
libtpu: 0.0.40
codegen_flags: <defaults>
</compile_context>

<pallas_src>
import functools
import math

import jax
import jax.numpy as jnp
from jax.experimental import pallas as pl
from jax.experimental.pallas import tpu as pltpu


def _t2v_kernel(xm_ref, a_ref, b_ref, out_ref, *, out_dim, pack):
    # xm_ref : (TILE_B, TILE_SP, pack)          time means, `pack` seq positions/row
    # a_ref  : (TILE_SP, pack*out_dim)          scales  [w0 | W], lane-packed
    # b_ref  : (TILE_SP, pack*out_dim)          offsets [phi0 | Phi], lane-packed
    # out_ref: (TILE_B, TILE_SP, pack*out_dim)  lane-dense output block
    lanes = pack * out_dim
    lane = jax.lax.broadcasted_iota(jnp.int32, (1, 1, lanes), 2)

    x = xm_ref[...]                                       # (TB, TSP, pack), f32
    # Lane-replicate: lane l must see the mean of packed seq slot l // out_dim.
    # TODO(synk): jnp.repeat / XLU gather was evaluated (review item) but the
    # bounded select chain is kept for lowering robustness; pack <= 8.
    xb = x[:, :, pack - 1:pack]                           # (TB, TSP, 1)
    for q in range(pack - 2, -1, -1):                     # static unroll, <= 7 selects
        xb = jnp.where(lane < (q + 1) * out_dim, x[:, :, q:q + 1], xb)

    # Single fused VPU multiply-add, sin, and a select for the linear lane.
    val = xb * a_ref[...][None] + b_ref[...][None]        # (TB, TSP, lanes), f32
    is_lin = (lane % out_dim) == 0                        # lane 0 of each packed slot
    out_ref[...] = jnp.where(is_lin, val, jnp.sin(val)).astype(out_ref.dtype)


def time2vec(x, w0, phi0, W, Phi, *, tile_rows=2048, out_dtype=None):
    """x: (B, S, F); w0, phi0: (1, S); W, Phi: (S, output_dim - 1).

    out_dtype=jnp.bfloat16 halves the dominant HBM writeback stream (compute
    stays f32; cast happens only at the store). Recommended where downstream
    precision allows.
    """
    B, S, F = x.shape
    K = W.shape[1]
    out_dim = K + 1
    out_dtype = x.dtype if out_dtype is None else out_dtype

    # Hoisted input reduction: the kernel only needs the per-(b, s) time mean.
    # (Same F >= 4 assumption as the reference slice x[:, :, :4].)
    xm = jnp.mean(x[:, :, :4].astype(jnp.float32), axis=-1)          # (B, S)

    # Fused parameter tables (tiny, built once in XLA).
    a_tab = jnp.concatenate([jnp.transpose(w0), W], axis=1).astype(jnp.float32)    # (S, out_dim)
    b_tab = jnp.concatenate([jnp.transpose(phi0), Phi], axis=1).astype(jnp.float32)

    # ---- Lane packing -----------------------------------------------------
    # Fold `pack` consecutive seq positions into one output row so the minor
    # dim is a multiple of 128 (unmasked vst instead of masked vst.msk).
    # Generalized: pack = lcm(128, out_dim) / out_dim, capped at 8 so the
    # in-kernel select chain stays short.  out_dim with pack > 8 (e.g. 8, 20)
    # falls back to pack=1 (correct, but masked-store path).
    base = math.lcm(128, out_dim) // out_dim
    pack = base if (base <= 8 and S % base == 0) else 1
    sp = S // pack
    lanes = pack * out_dim

    xm_p = xm.reshape(B, sp, pack)
    a_p = a_tab.reshape(sp, lanes)
    b_p = b_tab.reshape(sp, lanes)

    # ---- Tile sizing ------------------------------------------------------
    # Bound the sp extent per block (keeps VMEM bounded for long S, esp. on
    # v7x's 64 MiB), then pick a batch tile so each grid step carries
    # ~tile_rows packed rows (amortizes ~0.35us/step).  Output block is kept
    # <= ~2 MiB f32; note the xm input block is lane-padded to 128 in VMEM, so
    # it costs ~rows*512 B regardless of `pack`.
    max_rows = max(8, min(tile_rows, (2 * 1024 * 1024) // (lanes * 4)))
    if sp <= max_rows:
        tile_sp = sp                                  # == full extent (always legal)
    else:
        tile_sp = (max_rows // 8) * 8                 # second-minor dim must be 8-aligned
    tile_b = max(1, min(B, max_rows // tile_sp))

    grid_sp = pl.cdiv(sp, tile_sp)
    grid_b = pl.cdiv(B, tile_b)
    # v7x has 2 TensorCores: make sure there are >= 2 parallel grid steps
    # whenever the problem allows it.
    if grid_sp * grid_b < 2:
        if B >= 2:
            tile_b = pl.cdiv(B, 2)
            grid_b = pl.cdiv(B, tile_b)
        elif sp >= 16:
            tile_sp = ((pl.cdiv(sp, 2) + 7) // 8) * 8
            grid_sp = pl.cdiv(sp, tile_sp)

    kernel = functools.partial(_t2v_kernel, out_dim=out_dim, pack=pack)

    out_bytes = B * sp * lanes * jnp.dtype(out_dtype).itemsize
    cost = pl.CostEstimate(
        flops=B * S * out_dim * (pack + 2),
        transcendentals=B * S * (out_dim - 1),
        bytes_accessed=xm_p.size * 4 + 2 * sp * lanes * 4 + out_bytes,
    )

    out_p = pl.pallas_call(
        kernel,
        out_shape=jax.ShapeDtypeStruct((B, sp, lanes), out_dtype),
        grid_spec=pl.GridSpec(
            # sp axis OUTER, batch INNER: param block index is unchanged across
            # the inner batch loop, so Pallas skips its re-fetch.
            grid=(grid_sp, grid_b),
            in_specs=[
                pl.BlockSpec((tile_b, tile_sp, pack), lambda j, i: (i, j, 0)),
                pl.BlockSpec((tile_sp, lanes), lambda j, i: (j, 0)),
                pl.BlockSpec((tile_sp, lanes), lambda j, i: (j, 0)),
            ],
            out_specs=pl.BlockSpec((tile_b, tile_sp, lanes), lambda j, i: (i, j, 0)),
        ),
        compiler_params=pltpu.CompilerParams(
            dimension_semantics=("parallel", "parallel"),
            # Blocks are sized well under this on v5e/v6e/v7x alike.
            vmem_limit_bytes=32 * 1024 * 1024,
        ),
        cost_estimate=cost,
    )(xm_p, a_p, b_p)

    # Free reshape: identical row-major HBM layout as (B, sp, lanes).
    return out_p.reshape(B, S, out_dim)


def time2vec_ref(x, w0, phi0, W, Phi):
    xm = jnp.mean(x[:, :, :4], axis=-1)
    lin = (w0 * xm + phi0)[:, :, None]
    per = jnp.sin(xm[:, :, None] * W[None, :, :] + Phi[None, :, :])
    return jnp.concatenate([lin, per], axis=-1)


if __name__ == "__main__":
    B, S, F = 2, 8, 16          # batch, seq_len, features (features >= 4)
    output_dim = 32
    K = output_dim - 1

    key = jax.random.PRNGKey(0)
    kx, kw0, kphi0, kW, kPhi = jax.random.split(key, 5)

    x = jax.random.normal(kx, (B, S, F), dtype=jnp.float32)
    # uniform(0, 1) init, matching reset_parameters().
    w0 = jax.random.uniform(kw0, (1, S), dtype=jnp.float32)
    phi0 = jax.random.uniform(kphi0, (1, S), dtype=jnp.float32)
    W = jax.random.uniform(kW, (S, K), dtype=jnp.float32)
    Phi = jax.random.uniform(kPhi, (S, K), dtype=jnp.float32)

    ref = time2vec_ref(x, w0, phi0, W, Phi)

    # f32 output path (exact-ish).
    out = jax.block_until_ready(time2vec(x, w0, phi0, W, Phi))
    assert out.shape == (B, S, output_dim)
    assert jnp.allclose(out, ref, atol=1e-5, rtol=1e-5)

    # bf16 output path (halves the writeback stream; loose tolerance expected).
    out_bf16 = jax.block_until_ready(
        time2vec(x, w0, phi0, W, Phi, out_dtype=jnp.bfloat16))
    assert out_bf16.dtype == jnp.bfloat16
    assert jnp.allclose(out_bf16.astype(jnp.float32), ref, atol=2e-2, rtol=2e-2)

    print("KERNEL_OK")
</pallas_src>

<mosaic_0001>
module attributes {stable_mosaic.version = 11 : i64} {
  func.func @_t2v_kernel(%arg0: i32, %arg1: i32, %arg2: memref<1x2x4xf32, #tpu.memory_space<vmem>>, %arg3: memref<2x128xf32, #tpu.memory_space<vmem>>, %arg4: memref<2x128xf32, #tpu.memory_space<vmem>>, %arg5: memref<1x2x128xf32, #tpu.memory_space<vmem>>) attributes {dimension_semantics = [#tpu.dimension_semantics<parallel>, #tpu.dimension_semantics<parallel>], iteration_bounds = array<i64: 1, 2>, scalar_prefetch = 0 : i64, scratch_operands = 0 : i64, tpu.core_type = #tpu.core_type<tc>, window_params = [{transform_indices = @transform_0, window_bounds = array<i64: 1, 2, 4>}, {transform_indices = @transform_1, window_bounds = array<i64: 2, 128>}, {transform_indices = @transform_2, window_bounds = array<i64: 2, 128>}, {transform_indices = @transform_3, window_bounds = array<i64: 1, 2, 128>}]} {
    %0 = tpu.iota {dimensions = array<i32: 2>} : vector<1x1x128xi32>
    %c0 = arith.constant 0 : index
    %c0_0 = arith.constant 0 : index
    %c0_1 = arith.constant 0 : index
    %1 = vector.load %arg2[%c0, %c0_0, %c0_1] : memref<1x2x4xf32, #tpu.memory_space<vmem>>, vector<1x2x4xf32>
    %2 = vector.extract_strided_slice %1 {offsets = [0, 0, 3], sizes = [1, 2, 1], strides = [1, 1, 1]} : vector<1x2x4xf32> to vector<1x2x1xf32>
    %c96_i32 = arith.constant 96 : i32
    %3 = vector.broadcast %c96_i32 : i32 to vector<1x1x128xi32>
    %4 = arith.cmpi slt, %0, %3 : vector<1x1x128xi32>
    %5 = vector.extract_strided_slice %1 {offsets = [0, 0, 2], sizes = [1, 2, 1], strides = [1, 1, 1]} : vector<1x2x4xf32> to vector<1x2x1xf32>
    %6 = vector.shape_cast %4 : vector<1x1x128xi1> to vector<1x1x128xi1>
    %7 = vector.broadcast %6 : vector<1x1x128xi1> to vector<1x2x128xi1>
    %8 = vector.shape_cast %5 : vector<1x2x1xf32> to vector<1x2x1xf32>
    %9 = vector.broadcast %8 : vector<1x2x1xf32> to vector<1x2x128xf32>
    %10 = vector.shape_cast %2 : vector<1x2x1xf32> to vector<1x2x1xf32>
    %11 = vector.broadcast %10 : vector<1x2x1xf32> to vector<1x2x128xf32>
    %12 = arith.select %7, %9, %11 : vector<1x2x128xi1>, vector<1x2x128xf32>
    %c64_i32 = arith.constant 64 : i32
    %13 = vector.broadcast %c64_i32 : i32 to vector<1x1x128xi32>
    %14 = arith.cmpi slt, %0, %13 : vector<1x1x128xi32>
    %15 = vector.extract_strided_slice %1 {offsets = [0, 0, 1], sizes = [1, 2, 1], strides = [1, 1, 1]} : vector<1x2x4xf32> to vector<1x2x1xf32>
    %16 = vector.shape_cast %14 : vector<1x1x128xi1> to vector<1x1x128xi1>
    %17 = vector.broadcast %16 : vector<1x1x128xi1> to vector<1x2x128xi1>
    %18 = vector.shape_cast %15 : vector<1x2x1xf32> to vector<1x2x1xf32>
    %19 = vector.broadcast %18 : vector<1x2x1xf32> to vector<1x2x128xf32>
    %20 = arith.select %17, %19, %12 : vector<1x2x128xi1>, vector<1x2x128xf32>
    %c32_i32 = arith.constant 32 : i32
    %21 = vector.broadcast %c32_i32 : i32 to vector<1x1x128xi32>
    %22 = arith.cmpi slt, %0, %21 : vector<1x1x128xi32>
    %23 = vector.extract_strided_slice %1 {offsets = [0, 0, 0], sizes = [1, 2, 1], strides = [1, 1, 1]} : vector<1x2x4xf32> to vector<1x2x1xf32>
    %24 = vector.shape_cast %22 : vector<1x1x128xi1> to vector<1x1x128xi1>
    %25 = vector.broadcast %24 : vector<1x1x128xi1> to vector<1x2x128xi1>
    %26 = vector.shape_cast %23 : vector<1x2x1xf32> to vector<1x2x1xf32>
    %27 = vector.broadcast %26 : vector<1x2x1xf32> to vector<1x2x128xf32>
    %28 = arith.select %25, %27, %20 : vector<1x2x128xi1>, vector<1x2x128xf32>
    %c0_2 = arith.constant 0 : index
    %c0_3 = arith.constant 0 : index
    %29 = vector.load %arg3[%c0_2, %c0_3] : memref<2x128xf32, #tpu.memory_space<vmem>>, vector<2x128xf32>
    %30 = vector.shape_cast %29 : vector<2x128xf32> to vector<1x2x128xf32>
    %31 = arith.mulf %28, %30 : vector<1x2x128xf32>
    %c0_4 = arith.constant 0 : index
    %c0_5 = arith.constant 0 : index
    %32 = vector.load %arg4[%c0_4, %c0_5] : memref<2x128xf32, #tpu.memory_space<vmem>>, vector<2x128xf32>
    %33 = vector.shape_cast %32 : vector<2x128xf32> to vector<1x2x128xf32>
    %34 = arith.addf %31, %33 : vector<1x2x128xf32>
    %c32_i32_6 = arith.constant 32 : i32
    %c0_i32 = arith.constant 0 : i32
    %35 = arith.cmpi eq, %c32_i32_6, %c0_i32 : i32
    %c1_i32 = arith.constant 1 : i32
    %36 = arith.select %35, %c1_i32, %c32_i32_6 : i32
    %37 = vector.broadcast %36 : i32 to vector<1x1x128xi32>
    %38 = arith.remsi %0, %37 : vector<1x1x128xi32>
    %c0_i32_7 = arith.constant 0 : i32
    %39 = vector.broadcast %c0_i32_7 : i32 to vector<1x1x128xi32>
    %40 = arith.cmpi ne, %38, %39 : vector<1x1x128xi32>
    %c0_i32_8 = arith.constant 0 : i32
    %41 = vector.broadcast %c0_i32_8 : i32 to vector<1x1x128xi32>
    %42 = arith.cmpi slt, %38, %41 : vector<1x1x128xi32>
    %c0_i32_9 = arith.constant 0 : i32
    %43 = arith.cmpi slt, %36, %c0_i32_9 : i32
    %44 = vector.broadcast %43 : i1 to vector<1x1x128xi1>
    %45 = vector.broadcast %44 : vector<1x1x128xi1> to vector<1x1x128xi1>
    %46 = arith.xori %42, %45 : vector<1x1x128xi1>
    %47 = arith.andi %46, %40 : vector<1x1x128xi1>
    %48 = vector.broadcast %36 : i32 to vector<1x1x128xi32>
    %49 = arith.addi %38, %48 : vector<1x1x128xi32>
    %50 = arith.select %47, %49, %38 : vector<1x1x128xi1>, vector<1x1x128xi32>
    %c0_i32_10 = arith.constant 0 : i32
    %51 = vector.broadcast %c0_i32_10 : i32 to vector<1x1x128xi32>
    %52 = arith.cmpi eq, %50, %51 : vector<1x1x128xi32>
    %53 = math.sin %34 : vector<1x2x128xf32>
    %54 = vector.shape_cast %52 : vector<1x1x128xi1> to vector<1x1x128xi1>
    %55 = vector.broadcast %54 : vector<1x1x128xi1> to vector<1x2x128xi1>
    %56 = arith.select %55, %34, %53 : vector<1x2x128xi1>, vector<1x2x128xf32>
    %c0_11 = arith.constant 0 : index
    %c0_12 = arith.constant 0 : index
    %c0_13 = arith.constant 0 : index
    %57 = vector.load %arg5[%c0_11, %c0_12, %c0_13] : memref<1x2x128xf32, #tpu.memory_space<vmem>>, vector<1x2x128xf32>
    tpu.vector_store %arg5[%c0_11, %c0_12, %c0_13], %56 {strides = array<i32>} : memref<1x2x128xf32, #tpu.memory_space<vmem>>, vector<1x2x128xf32>,
    return
  }
  func.func @transform_0(%arg0: i32, %arg1: i32) -> (i32, i32, i32) {
    %c0_i32 = arith.constant 0 : i32
    %c0_i32_0 = arith.constant 0 : i32
    return %arg1, %arg0, %c0_i32 : i32, i32, i32
  }
  func.func @transform_1(%arg0: i32, %arg1: i32) -> (i32, i32) {
    %c0_i32 = arith.constant 0 : i32
    %c0_i32_0 = arith.constant 0 : i32
    return %arg0, %c0_i32 : i32, i32
  }
  func.func @transform_2(%arg0: i32, %arg1: i32) -> (i32, i32) {
    %c0_i32 = arith.constant 0 : i32
    %c0_i32_0 = arith.constant 0 : i32
    return %arg0, %c0_i32 : i32, i32
  }
  func.func @transform_3(%arg0: i32, %arg1: i32) -> (i32, i32, i32) {
    %c0_i32 = arith.constant 0 : i32
    %c0_i32_0 = arith.constant 0 : i32
    return %arg1, %arg0, %c0_i32 : i32, i32, i32
  }
}

</mosaic_0001>

<bundles_post_ra>
// kernel: tpu_custom_call.1
= control target key start
LH: loop header
LB: loop body
LE: loop exit
PB: predicated region body
PF: predicated region fallthrough
CT: control target
= control target key end

     0   :  { %8 = vsyncpa [#allocation3], 0  ;;  %s979_s0 = inlined_call_operand.hbm [shape: f32[2,2,4], index: 0, kind: input, shape index: {}]   ;;  %s980_s1 = inlined_call_operand.vmem [shape: f32[2,128], index: 1, kind: input, shape index: {}]   ;;  %s981_s2 = inlined_call_operand.vmem [shape: f32[2,128], index: 2, kind: input, shape index: {}]   ;;  %s982_s3 = inlined_call_operand.hbm [shape: f32[2,2,128], index: 3, kind: output, shape index: {}]  }
   0x1   :  { %10 = vsyncpa [#allocation3 + $0x1], 0 }
   0x2   :  { %11 = vsyncpa [#allocation4], 0 }
   0x3   :  { %13 = vsyncpa [#allocation4 + $0x1], 0  ;;  %s769_s12 = smov 0   ;;  %s771_s13 = smov 0  }
   0x4   :  { %s773_s14 = smov 0   ;;  %s775_s15 = smov 0  }
   0x5   :  { %s777_s16 = smov 0   ;;  %s779_s17 = smov 0  }
   0x6 LB: > { %s519_s18 = sadd.s32 4294967295, %s735_s17   ;;  %s520_s19 = sadd.s32 4294967294, %s735_s17   ;;  %s735_s17 = sphi %s779_s17, %s19_s17   ;;  %s731_s16 = sphi %s777_s16, %s998_s16   ;;  %s727_s15 = sphi %s775_s15, %s997_s15   ;;  %s723_s14 = sphi %s773_s14, %s996_s14   ;;  %s719_s13 = sphi %s771_s13, %s995_s13   ;;  %s715_s12 = sphi %s769_s12, %s994_s12  }
   0x7   : > { %s28_s20 = sadd.s32 1, %s731_s16  ;;  %s40_s21 = sadd.s32 1, %s723_s14 }
   0x8   : > { %p29_p0 = scmp.ge.s32.totalorder %s28_s20, 2  ;;  %p47_p1 = scmp.ne.s32.totalorder %s723_s14, %s719_s13 }
   0x9   : > { %p48_p2 = scmp.eq.s32.totalorder %s735_s17, 0  ;;  %p53_p3 = scmp.ne.s32.totalorder %s719_s13, %s715_s12 }
   0xa   : > { %s1000_s20 = smov (%p29_p0, %s28_s20), 0  ;;  %p54_p5 = scmp.eq.s32.totalorder %s519_s18, 0 }
   0xb   : > { %p810_p4 = por %p48_p2, %p47_p1  ;;  %s35_s23 = ssub.s32 %s731_s16, %s1000_s20 }
   0xc   : > { %p131_p6 = scmp.eq.s32.totalorder %s519_s18, 1  ;;  %p38_p7 = scmp.eq.s32.totalorder %s35_s23, 0 }
   0xd   : > { %p816_p8 = por %p54_p5, %p53_p3  ;;  %p137_p10 = scmp.eq.s32.totalorder %s520_s19, 1 }
   0xe   : > { %p820_p9 = por %p131_p6, %p47_p1  ;;  %p554_p13 = scmp.lt.s32.totalorder %s735_s17, 2 }
   0xf   : > { %s825_s26 = scalar_select %p38_p7, %s723_s14, %s40_s21  }
  0x10   : > { %s986_s25 = scalar_select %p820_p9, 1, 0 }
  0x11   : > { %p827_p11 = por %p137_p10, %p53_p3  ;;  %s171_s28 = sand.u32 1, %s723_s14  }
  0x12   : > { %s525_s29 = sshll.u32 %s171_s28, 1  ;;  %s526_s30 = sshll.u32 %s731_s16, 5 }
  0x13   : > { %s987_s27 = scalar_select %p827_p11, 1, 0 }
  0x14   : > { %s838_s6 = scalar_lea.hbm %s979_s0, %s526_s30  ;;  %s175_s7 = scalar_lea.vmem [#allocation2], %s525_s29 }
  0x15   : > { %s183_s8 = sshll.u32 %s175_s7, 4  ;;  %p844_p0 = pnand %p554_p13, %p810_p4  ;;  %s840_s8 = int_to_ptr.vmem [resolvable:$true] %s183_s8 }
  0x16   : > { %s172_s10 = scalar_lea.sflag [#allocation3], %s171_s28  ;;  %s623_s11 = scalar_lea.hbm %s838_s6, 32 }
  0x17   : > { %p624_p3 = scmp.ne.s32.totalorder %s838_s6, %s623_s11  ;;  %p625_p5 = pneg %p844_p0 }
  0x18   : > { %s628_s21 = scalar_lea.hbm %s979_s0, 64  ;;  %p629_p4 = scmp.lt.u32.totalorder %s838_s6, %s979_s0 }
  0x19   : > { %p626_p6 = pnand %p625_p5, %p624_p3  ;;  %p630_p10 = scmp.lt.u32.totalorder %s628_s21, %s623_s11 }
  0x1a   : > { %p632_p12 = scmp.lt.u32.totalorder %s623_s11, %s838_s6 }
  0x1b   : > { %p627_p7 = pneg %p626_p6  ;;  %p631_p13 = por %p630_p10, %p629_p4 }
  0x1d   : > { %p633_p1 = por %p632_p12, %p631_p13 }
  0x1f   : > { %p634_p2 = pnand %p633_p1, %p627_p7 }
  0x21   : > { %637 = shalt.err (!%p634_p2)
}
  0x22   : > { %s638_s28 = scalar_lea.vmem %s840_s8, 32  ;;  %s737_s29 = smov [#allocation2]  }
  0x23   : > { %p639_p3 = scmp.ne.s32.totalorder %s840_s8, %s638_s28  ;;  %s643_s30 = sshll.u32 %s737_s29, 4  ;;  %s644_s30 = int_to_ptr.vmem [resolvable:$false] %s643_s30 }
  0x24   : > { %s645_s4 = scalar_lea.vmem %s644_s30, 64  ;;  %p646_p9 = scmp.lt.s32.totalorder %s840_s8, %s644_s30 }
  0x25   : > { %p641_p6 = pnand %p639_p3, %p625_p5  ;;  %p647_p4 = scmp.lt.s32.totalorder %s645_s4, %s638_s28 }
  0x27   : > { %p642_p11 = pneg %p641_p6  ;;  %p648_p10 = por %p647_p4, %p646_p9 }
  0x29   : > { %p649_p12 = pnand %p648_p10, %p642_p11 }
  0x2b   : > { %652 = shalt.err (!%p649_p12)
}
  0x2c   : > { %549 = dma.hbm_to_vmem [thread:$0]  (!%p844_p0), %s838_s6, 32, %s840_s8, %s172_s10  }
  0x2d   : > { %p989_p1 = scmp.lt.s32.totalorder %s735_s17, 3  ;;  %p990_p2 = scmp.ge.s32.totalorder %s735_s17, 1 }
  0x2f   : > { %p189_p5 = pnand %p990_p2, %p989_p1 }
  0x30   : > { %s880_s5 = sand.u32 (!%p189_p5), 1, %s719_s13  }
  0x31   : > { %192 = sbr.rel (%p189_p5) target bundleno = 293 (0x125), region = 32  ;;  %s528_s7 = sshll.u32 (!%p189_p5), %s880_s5, 1 }
  0x32   : > { %s195_s11 = scalar_lea.sflag (!%p189_p5), [#allocation3], %s880_s5  ;;  %s198_s9 = scalar_lea.vmem (!%p189_p5), [#allocation2], %s528_s7 }
  0x38   : > { %706 = dma.done.wait (%p816_p8), %s195_s11, 32  }
  0x39   : > { %708 = vsyncadd (%p816_p8), %s195_s11, 4294967264  ;;  %v738_v0 = vmov 2   ;;  %v739_v1 = vmov 1   ;;  %v239_v2 = vld [vmem:[%s198_s9] sm:$0x3]  ;;  %v740_v3 = vmov 3   ;;  %v237_v5 = vlaneseq }
  0x3a   : > { %614 = vset.pattern.permute.xlu0 %v738_v0  ;;  %616 = vset.pattern.permute.xlu1 %v739_v1  ;;  %v741_v4 = vmov 0   ;;  %v269_v12 = vld [vmem:[%s980_s1] sm:$0x3]  ;;  %v742_v29 = vmov 2102212464   ;;  %s535_s18 = sshll.u32 %s727_s15, 5 }
  0x3b   : > { %245 = vperm.xlu0 %614, %v239_v2   ;;  %257 = vperm.xlu1 %616, %v239_v2   ;;  %v890_v6 = vand.u32 127, %v237_v5  ;;  %v271_v14 = vld [vmem:[%s981_s2] sm:$0x3]  ;;  %v743_v31 = vmov 920167782   ;;  %s228_s19 = scalar_lea.vmem [#allocation5], %s528_s7  ;;  %s929_s28 = scalar_lea.hbm %s982_s3, %s535_s18 }
  0x3c   : > { %v744_v35 = vmov 1326507024   ;;  %v745_v37 = vmov 683565275   ;;  %v746_v39 = vmov 2475754826  }
  0x3d   : > { %vm240_vm0 = vcmp.lt.s32.totalorder %v890_v6, 96  ;;  %vm253_vm1 = vcmp.lt.s32.totalorder %v890_v6, 64  ;;  %vm261_vm2 = vcmp.lt.s32.totalorder %v890_v6, 32  ;;  %v747_v42 = vmov 2131351028   ;;  %s409_s21 = sshll.u32 %s228_s19, 4  ;;  %s931_s21 = int_to_ptr.vmem [resolvable:$true] %s409_s21 }
  0x3e   : > { %s395_s15 = scalar_lea.sflag [#allocation4], %s880_s5  ;;  %s653_s29 = scalar_lea.vmem %s931_s21, 32 }
  0x3f   : > { %615 = vset.pattern.permute.xlu0 %v740_v3  ;;  %617 = vset.pattern.permute.xlu1 %v741_v4  ;;  %p654_p8 = scmp.ne.s32.totalorder %s931_s21, %s653_s29  ;;  %p991_p9 = scmp.ne.s32.totalorder %s986_s25, 0 }
  0x40   : > { %249 = vperm.xlu0 %615, %v239_v2   ;;  %265 = vperm.xlu1 %617, %v239_v2   ;;  %s748_s30 = smov [#allocation5]  }
  0x41   : > { %p655_p11 = pnand %p654_p8, %p991_p9  ;;  %s657_s4 = sshll.u32 %s748_s30, 4  ;;  %s658_s4 = int_to_ptr.vmem [resolvable:$false] %s657_s4 }
  0x42   : > { %s659_s7 = scalar_lea.vmem %s658_s4, 64  ;;  %p660_p7 = scmp.lt.s32.totalorder %s931_s21, %s658_s4 }
  0x43   : > { %p656_p0 = pneg %p655_p11  ;;  %p661_p13 = scmp.lt.s32.totalorder %s659_s7, %s653_s29 }
  0x44   : > { %618 = vset.pattern.permute.xlu0 %v741_v4 }
  0x45   : > { %p662_p3 = por %p661_p13, %p660_p7 }
  0x47   : > { %p663_p6 = pnand %p662_p3, %p656_p0 }
  0xba   : > { %v246_v7 = vpop.permute.xlu0 %245  ;;  %v258_v8 = vpop.permute.xlu1 %257 }
  0xbf   : > { %v250_v9 = vpop.permute.xlu0 %249  ;;  %v266_v10 = vpop.permute.xlu1 %265 }
  0xc0   : > { %v252_v11 = vsel %vm240_vm0, %v246_v7, %v250_v9 }
  0xc1   : > { %v260_v13 = vsel %vm253_vm1, %v258_v8, %v252_v11 }
  0xc2   : > { %v268_v15 = vsel %vm261_vm2, %v266_v10, %v260_v13 }
  0xc3   : > { %v270_v16 = vmul.f32 %v269_v12, %v268_v15 }
  0xc5   : > { %v901_v17 = vadd.f32 %v271_v14, %v270_v16 }
  0xc7   : > { %v289_v18 = vand.u32 2139095040, %v901_v17  ;;  %v286_v19 = vand.u32 2147483647, %v901_v17  ;;  %vm288_vm10 = vcmp.lt.s32.totalorder %v901_v17, 0  ;;  %vm378_vm0 = vweird.f32 %v901_v17 }
  0xc9   : > { %v290_v20 = vshrl.u32 %v289_v18, 23  ;;  %v293_v22 = vand.u32 8388607, %v286_v19  ;;  %vm287_vm11 = vcmp.le.f32.partialorder %v286_v19, 0.7853982 }
  0xcb   : > { %v530_v21 = vadd.s32 4294967169, %v290_v20  ;;  %v294_v25 = vor.u32 8388608, %v293_v22 }
  0xcd   : > { %v296_v23 = vadd.s32 1, %v530_v21  ;;  %v334_v33 = vshll.u32 %v294_v25, 8 }
  0xcf   : > { %vm297_vm3 = vcmp.gt.s32.totalorder %v296_v23, 0 }
  0xd0   : > { %v298_v24 = vsel %vm297_vm3, %v296_v23, 0 }
  0xd1   : > { %v300_v26 = vand.u32 31, %v298_v24  ;;  %v299_v27 = vshrl.u32 %v298_v24, 5 }
  0xd3   : > { %v301_v28 = vsub.s32 32, %v300_v26  ;;  %v312_v30 = vshll.u32 %v742_v29, %v300_v26  ;;  %v315_v32 = vshll.u32 %v743_v31, %v300_v26  ;;  %v303_v38 = vshll.u32 %v745_v37, %v300_v26 }
  0xd4   : > { %v306_v41 = vshll.u32 %v746_v39, %v300_v26  ;;  %v309_v44 = vshll.u32 %v747_v42, %v300_v26  ;;  %vm321_vm4 = vcmp.lt.s32.totalorder %v299_v27, 4  ;;  %vm318_vm5 = vcmp.lt.s32.totalorder %v299_v27, 1 }
  0xd5   : > { %v313_v34 = vshrl.u32 %v743_v31, %v301_v28  ;;  %v316_v36 = vshrl.u32 %v744_v35, %v301_v28  ;;  %v304_v40 = vshrl.u32 %v746_v39, %v301_v28  ;;  %v307_v43 = vshrl.u32 %v747_v42, %v301_v28 }
  0xd6   : > { %v310_v45 = vshrl.u32 %v742_v29, %v301_v28  ;;  %v302_v49 = vshrl.u32 %v745_v37, %v301_v28  ;;  %vm319_vm6 = vcmp.lt.s32.totalorder %v299_v27, 2  ;;  %vm320_vm7 = vcmp.lt.s32.totalorder %v299_v27, 3 }
  0xd7   : > { %v314_v46 = vor.u32 %v313_v34, %v312_v30  ;;  %v317_v47 = vor.u32 %v316_v36, %v315_v32  ;;  %v305_v48 = vor.u32 %v304_v40, %v303_v38  ;;  %v308_v50 = vor.u32 %v307_v43, %v306_v41 }
  0xd8   : > { %v311_v51 = vor.u32 %v310_v45, %v309_v44  ;;  %v277_v41 = vand.u32 31, %v890_v6 }
  0xd9   : > { %v327_v52 = vsel %vm321_vm4, %v314_v46, 920167782  ;;  %v331_v53 = vsel %vm321_vm4, %v317_v47, 1326507024  ;;  %v326_v55 = vsel %vm318_vm5, %v305_v48, %v308_v50  ;;  %v322_v58 = vsel %vm318_vm5, %v302_v49, %v305_v48 }
  0xda   : > { %v323_v54 = vsel %vm321_vm4, %v311_v51, 2102212464  ;;  %v328_v56 = vsel %vm320_vm7, %v311_v51, %v327_v52  ;;  %v330_v57 = vsel %vm318_vm5, %v308_v50, %v311_v51  ;;  %v332_v61 = vsel %vm320_vm7, %v314_v46, %v331_v53 }
  0xdb   : > { %v324_v59 = vsel %vm320_vm7, %v308_v50, %v323_v54  ;;  %v329_v60 = vsel %vm319_vm6, %v326_v55, %v328_v56  ;;  %v333_v62 = vsel %vm319_vm6, %v330_v57, %v332_v61  ;;  %vm285_vm14 = vcmp.eq.s32.totalorder %v277_v41, 0 }
  0xdc   : > { %v907_v63 = vmul.u32.u64.low %v334_v33, %v329_v60  ;;  %v908_v0 = vmul.u32.u64.high %v334_v33, %v329_v60, %v907_v63  ;;  %v910_v1 = vmul.u32.u64.low %v334_v33, %v333_v62  ;;  %v911_v2 = vmul.u32.u64.high %v334_v33, %v333_v62, %v910_v1 }
  0xdd   : > { %v325_v3 = vsel %vm319_vm6, %v322_v58, %v324_v59 }
  0xde   : > { %v344_v4 = vadd.s32 1, %v908_v0  ;;  %v341_v5 = vmul.u32 %v334_v33, %v325_v3  ;;  %vm343_vm8 = vc.u32 %v911_v2, %v907_v63  ;;  %v342_v20 = vadd.s32 %v907_v63, %v911_v2 }
  0xe0   : > { %v345_v7 = vsel %vm343_vm8, %v344_v4, %v908_v0 }
  0xe1   : > { %v346_v8 = vadd.s32 %v345_v7, %v341_v5 }
  0xe3   : > { %v347_v9 = vadd.s32 536870912, %v346_v8 }
  0xe5   : > { %v348_v10 = vshrl.u32 %v347_v9, 30 }
  0xe7   : > { %v349_v11 = vshll.u32 %v348_v10, 30  ;;  %v372_v32 = vsub.s32 4, %v348_v10 }
  0xe9   : > { %v350_v12 = vsub.s32 %v346_v8, %v349_v11  ;;  %v373_v35 = vsel %vm288_vm10, %v372_v32, %v348_v10 }
  0xea   : > { %v375_v37 = vsel %vm287_vm11, 0, %v373_v35 }
  0xeb   : > { %v352_v13 = vsub.s32 0, %v350_v12  ;;  %v379_v38 = vadd.s32 3, %v375_v37 }
  0xed   : > { %v531_v14 = vmin.u32 %v352_v13, %v350_v12  ;;  %v380_v39 = vand.u32 3, %v379_v38 }
  0xef   : > { %v354_v15 = vclz %v531_v14  ;;  %vm385_vm12 = vcmp.eq.s32.totalorder %v380_v39, 2  ;;  %vm382_vm13 = vcmp.eq.s32.totalorder %v380_v39, 0  ;;  %vm381_vm15 = vcmp.lt.s32.totalorder %v380_v39, 2 }
  0xf1   : > { %v532_v16 = vadd.s32 4294967294, %v354_v15 }
  0xf3   : > { %vm533_vm9 = vcmp.lt.s32.totalorder %v532_v16, 0 }
  0xf4   : > { %v357_v18 = vsel %vm533_vm9, 0, %v532_v16 }
  0xf5   : > { %v358_v21 = vsub.s32 32, %v357_v18  ;;  %v362_v22 = vsub.s32 4294967266, %v357_v18  ;;  %v359_v23 = vshll.u32 %v350_v12, %v357_v18 }
  0xf7   : > { %v360_v24 = vshrl.u32 %v342_v20, %v358_v21  ;;  %v363_v25 = vadd.s32 127, %v362_v22 }
  0xf9   : > { %v361_v26 = vor.u32 %v360_v24, %v359_v23  ;;  %v364_v27 = vshll.u32 %v363_v25, 23 }
  0xfb   : > { %v365_v28 = vor.u32 4788187, %v364_v27  ;;  %v368_v30 = vcvt.s32.f32 %v361_v26 }
  0xfd   : > { %v366_v29 = vand.u32 2147483647, %v365_v28 }
  0xff   : > { %v369_v31 = vmul.f32 %v368_v30, %v366_v29 }
 0x101   : > { %v370_v33 = vxor.u32 2147483648, %v369_v31 }
 0x103   : > { %v371_v34 = vsel %vm288_vm10, %v370_v33, %v369_v31 }
 0x104   : > { %v374_v36 = vsel %vm287_vm11, %v901_v17, %v371_v34 }
 0x105   : > { %619 = vcosq.f32 %v374_v36 }
 0x106   : > { %621 = vsinq.f32 %v374_v36 }
 0x10f   : > { %v620_v40 = vpop.eup %619 }
 0x110   : > { %v622_v42 = vpop.eup %621  ;;  %v386_v43 = vxor.u32 2147483648, %v620_v40 }
 0x111   : > { %v383_v44 = vxor.u32 2147483648, %v622_v42 }
 0x112   : > { %v387_v19 = vsel %vm385_vm12, %v386_v43, %v622_v42 }
 0x113   : > { %v384_v45 = vsel %vm382_vm13, %v620_v40, %v383_v44 }
 0x114   : > { %v388_v46 = vsel %vm381_vm15, %v384_v45, %v387_v19 }
 0x115   : > { %v389_v47 = vsel %vm378_vm0, nan, %v388_v46 }
 0x116   : > { %v392_v6 = vsel %vm285_vm14, %v901_v17, %v389_v47 }
 0x117   : > { %393 = vst [vmem:[%s228_s19] sm:$0x3] %v392_v6 }
 0x118   : > { %666 = shalt.err (!%p663_p6)
}
 0x119   : > { %s667_s5 = scalar_lea.hbm %s929_s28, 32  ;;  %s671_s24 = scalar_lea.hbm %s982_s3, 64 }
 0x11a   : > { %p668_p4 = scmp.ne.s32.totalorder %s929_s28, %s667_s5  ;;  %p672_p1 = scmp.lt.u32.totalorder %s929_s28, %s982_s3 }
 0x11b   : > { %p673_p2 = scmp.lt.u32.totalorder %s671_s24, %s667_s5  ;;  %p675_p8 = scmp.lt.u32.totalorder %s667_s5, %s929_s28 }
 0x11c   : > { %p669_p10 = pnand %p668_p4, %p991_p9 }
 0x11d   : > { %p674_p5 = por %p673_p2, %p672_p1 }
 0x11e   : > { %p670_p12 = pneg %p669_p10 }
 0x11f   : > { %p676_p11 = por %p675_p8, %p674_p5 }
 0x121   : > { %p677_p0 = pnand %p676_p11, %p670_p12 }
 0x123   : > { %680 = shalt.err (!%p677_p0)
}
 0x124   : > { %544 = dma.vmem_to_hbm [thread:$0]  (%p991_p9), %s931_s21, 32, %s929_s28, %s395_s15  }
 0x125 PF: > { %s421_s10 = sand.u32 1, %s715_s12   ;;  %p992_p7 = scmp.ne.s32.totalorder %s987_s27, 0 }
 0x126   : > { %p993_p13 = scmp.ge.s32.totalorder %s735_s17, 2  ;;  %s422_s18 = scalar_lea.sflag [#allocation4], %s421_s10 }
 0x128   : > { %p551_p3 = pnand %p993_p13, %p992_p7 }
 0x12a   : > { %710 = dma.done.wait (!%p551_p3), %s422_s18, 32  }
 0x12b   : > { %712 = vsyncadd (!%p551_p3), %s422_s18, 4294967264  ;;  %s19_s17 = sadd.s32 1, %s735_s17   ;;  %s994_s12 = smov %s719_s13 }
 0x12c   : > { %p16_p6 = scmp.ge.s32.totalorder %s19_s17, 4   ;;  %s995_s13 = smov %s723_s14 }
 0x12d   : > { %s996_s14 = smov %s825_s26  ;;  %s997_s15 = smov %s731_s16 }
 0x12e   : > { %s998_s16 = smov %s1000_s20  ;;  %18 = sbr.rel (!%p16_p6) target bundleno = 6 (0x6), region = 83 }
 0x135   :  { %427 = vsyncpa [#allocation3], 1 }
 0x136   :  { %429 = vsyncpa [#allocation3 + $0x1], 1 }
 0x137   :  { %430 = vsyncpa [#allocation4], 1 }
 0x138   :  { %432 = vsyncpa [#allocation4 + $0x1], 1 }

</bundles_post_ra>
